<compile_context>
chip_gen: v7x
topology: tpu7x:2x2x1
jax: 0.10.0
libtpu: 0.0.40
codegen_flags: <defaults>
</compile_context>

<pallas_src>
import functools

import jax
import jax.numpy as jnp
from jax.experimental import pallas as pl
from jax.experimental.pallas import tpu as pltpu

LANE = 128
SUBLANE = 8
MAX_BLOCK_ROWS = 4096                    # (4096, 128) f32 block = 2 MiB
VMEM_LIMIT_BYTES = 32 * 1024 * 1024      # explicit so v5e (16 MiB default) fits


# ----------------------------------------------------------------------------
# Kernel 1a: fisher from grads only (first task / offline):
#   fisher = grad**2 / batchsize
# ----------------------------------------------------------------------------
def _fisher_first_kernel(grad_ref, out_ref, *, inv_batch):
    g = grad_ref[...]
    out_ref[...] = g * g * inv_batch


# ----------------------------------------------------------------------------
# Kernel 1b: online fisher update:
#   fisher = grad**2 / batchsize + gamma * old_fisher
# ----------------------------------------------------------------------------
def _fisher_online_kernel(grad_ref, old_ref, out_ref, *, inv_batch, gamma):
    g = grad_ref[...]
    out_ref[...] = g * g * inv_batch + gamma * old_ref[...]


def _block_rows(R):
    br = min(R, MAX_BLOCK_ROWS)
    assert R % br == 0, (R, br)
    return br


def fisher_from_grad(grad_slab, *, batchsize):
    """(R, 128) grads -> (1, R, 128) fisher (stacked form, ready to store)."""
    R, C = grad_slab.shape
    assert C == LANE
    br = _block_rows(R)
    kernel = functools.partial(_fisher_first_kernel, inv_batch=1.0 / float(batchsize))
    return pl.pallas_call(
        kernel,
        out_shape=jax.ShapeDtypeStruct((1, R, C), jnp.float32),
        grid_spec=pltpu.PrefetchScalarGridSpec(
            num_scalar_prefetch=0,
            grid=(R // br,),
            in_specs=[pl.BlockSpec((br, LANE), lambda i: (i, 0))],
            out_specs=pl.BlockSpec((None, br, LANE), lambda i: (0, i, 0)),
        ),
        compiler_params=pltpu.CompilerParams(
            dimension_semantics=("parallel",),
            vmem_limit_bytes=VMEM_LIMIT_BYTES,
        ),
    )(grad_slab)


def fisher_update_online(grad_slab, old_fisher_stk, *, batchsize, gamma):
    """(R,128) grads + (1,R,128) old fisher -> (1,R,128) new fisher."""
    R, C = grad_slab.shape
    assert C == LANE and old_fisher_stk.shape == (1, R, C)
    br = _block_rows(R)
    kernel = functools.partial(
        _fisher_online_kernel, inv_batch=1.0 / float(batchsize), gamma=float(gamma)
    )
    return pl.pallas_call(
        kernel,
        out_shape=jax.ShapeDtypeStruct((1, R, C), jnp.float32),
        grid_spec=pltpu.PrefetchScalarGridSpec(
            num_scalar_prefetch=0,
            grid=(R // br,),
            in_specs=[
                pl.BlockSpec((br, LANE), lambda i: (i, 0)),
                pl.BlockSpec((None, br, LANE), lambda i: (0, i, 0)),
            ],
            out_specs=pl.BlockSpec((None, br, LANE), lambda i: (0, i, 0)),
        ),
        compiler_params=pltpu.CompilerParams(
            dimension_semantics=("parallel",),
            vmem_limit_bytes=VMEM_LIMIT_BYTES,
        ),
        # Old fisher is dead after the update -> reuse its HBM buffer.
        input_output_aliases={1: 0},
    )(grad_slab, old_fisher_stk)


# ----------------------------------------------------------------------------
# Kernel 2: fused EWC quadratic loss over T tasks
#   loss = scale * sum_t sum( fisher[t] * (theta - mean[t])**2 )
#
# Grid = (row_blocks, T) with T innermost: theta block is DMA'd once per row
# block (index_map invariant in t); mean/fisher stream (1, br, 128) blocks so
# the block size never shrinks with T.  Vector accumulator in VMEM; single
# cross-lane reduce at the very end, written to an SMEM scalar output.
# ----------------------------------------------------------------------------
def _ewc_loss_kernel(theta_ref, mean_ref, fisher_ref, out_ref, acc_ref):
    i = pl.program_id(0)
    t = pl.program_id(1)

    @pl.when((i == 0) & (t == 0))
    def _():
        acc_ref[...] = jnp.zeros_like(acc_ref)

    d = theta_ref[...] - mean_ref[...]
    acc_ref[...] += fisher_ref[...] * d * d

    @pl.when((i == pl.num_programs(0) - 1) & (t == pl.num_programs(1) - 1))
    def _():
        out_ref[0] = jnp.sum(acc_ref[...])


def ewc_quadratic_loss(theta_slab, mean_slabs, fisher_slabs, *, scale):
    T, R, C = mean_slabs.shape
    assert C == LANE and theta_slab.shape == (R, C)
    assert fisher_slabs.shape == (T, R, C)
    br = _block_rows(R)
    steps = R // br

    total = pl.pallas_call(
        _ewc_loss_kernel,
        out_shape=jax.ShapeDtypeStruct((1,), jnp.float32),
        grid_spec=pltpu.PrefetchScalarGridSpec(
            num_scalar_prefetch=0,
            grid=(steps, T),
            in_specs=[
                pl.BlockSpec((br, LANE), lambda i, t: (i, 0)),          # theta
                pl.BlockSpec((None, br, LANE), lambda i, t: (t, i, 0)),  # means
                pl.BlockSpec((None, br, LANE), lambda i, t: (t, i, 0)),  # fishers
            ],
            out_specs=pl.BlockSpec(memory_space=pltpu.MemorySpace.SMEM),
            scratch_shapes=[pltpu.VMEM((br, LANE), jnp.float32)],
        ),
        compiler_params=pltpu.CompilerParams(
            dimension_semantics=("arbitrary", "arbitrary"),
            vmem_limit_bytes=VMEM_LIMIT_BYTES,
        ),
    )(theta_slab, mean_slabs, fisher_slabs)
    return jnp.float32(scale) * total[0]


# ----------------------------------------------------------------------------
# Glue: flatten a dict of parameter tensors into a lane-aligned slab.
# Padding is only to 8-row granularity (plus, for big models, a multiple of
# the 4096-row block), so small models don't stream megabytes of zeros.
# ----------------------------------------------------------------------------
def flatten_to_slab(params):
    leaves = [jnp.ravel(p).astype(jnp.float32) for p in jax.tree_util.tree_leaves(params)]
    flat = jnp.concatenate(leaves)
    n = flat.shape[0]
    tile = LANE * SUBLANE
    rows = pl.cdiv(max(n, 1), tile) * SUBLANE
    if rows > MAX_BLOCK_ROWS:
        rows = pl.cdiv(rows, MAX_BLOCK_ROWS) * MAX_BLOCK_ROWS
    n_pad = rows * LANE
    flat = jnp.pad(flat, (0, n_pad - n))
    return flat.reshape(rows, LANE)


class EWCPallas:
    """Pallas-backed EWC: fisher estimation + quadratic penalty.

    Mirrors pyhanabi/ewc.py semantics.  Parameters / gradients are handled in
    flattened slab form ((R, 128) f32); means & fishers are stored pre-stacked
    as (T, R, 128) so the loss path never re-flattens or re-stacks state.
    """

    def __init__(self, ewc_gamma, online, batchsize, pred_weight=0.0):
        self.ewc_gamma = float(ewc_gamma)
        self.online = bool(online)
        self.batchsize = int(batchsize)
        self.pred_weight = float(pred_weight)
        self._means = None    # (T, R, 128)
        self._fishers = None  # (T, R, 128)

    def estimate_fisher(self, mean_slab, grad_slab, task_idx):
        # TODO(synk): agent.loss(batch,...).backward() (autograd) has no
        # in-kernel equivalent; gradients are an explicit input here.
        if self.online and task_idx > 0 and self._fishers is not None:
            fisher_stk = fisher_update_online(
                grad_slab, self._fishers,
                batchsize=self.batchsize, gamma=self.ewc_gamma,
            )
        else:
            fisher_stk = fisher_from_grad(grad_slab, batchsize=self.batchsize)
        mean_stk = mean_slab[None]
        if self.online or self._means is None:
            self._means = mean_stk
            self._fishers = fisher_stk
        else:
            self._means = jnp.concatenate([self._means, mean_stk], axis=0)
            self._fishers = jnp.concatenate([self._fishers, fisher_stk], axis=0)

    def compute_ewc_loss(self, theta_slab, task_idx):
        if task_idx <= 0 or self._means is None:
            return jnp.float32(0.0)
        if self.online:
            means, fishers = self._means, self._fishers
            scale = 0.5 * self.ewc_gamma
        else:
            use = min(task_idx, self._means.shape[0])
            if use == self._means.shape[0]:
                means, fishers = self._means, self._fishers
            else:
                means, fishers = self._means[:use], self._fishers[:use]
            scale = 0.5
        return ewc_quadratic_loss(theta_slab, means, fishers, scale=scale)


# ----------------------------------------------------------------------------
# Demo / self-check
# ----------------------------------------------------------------------------
def _make_params(key, scale=1.0):
    # Synthetic "online_net" parameters: two small dense layers.
    k1, k2, k3, k4 = jax.random.split(key, 4)
    return {
        "fc1__weight": scale * jax.random.normal(k1, (32, 64), jnp.float32),
        "fc1__bias": scale * jax.random.normal(k2, (64,), jnp.float32),
        "fc2__weight": scale * jax.random.normal(k3, (64, 32), jnp.float32),
        "fc2__bias": scale * jax.random.normal(k4, (32,), jnp.float32),
    }


if __name__ == "__main__":
    key = jax.random.PRNGKey(0)
    k_p0, k_g0, k_d1, k_g1, k_d2 = jax.random.split(key, 5)

    batchsize = 2
    gamma = 0.9

    # ---------------- online EWC ----------------
    ewc = EWCPallas(ewc_gamma=gamma, online=True, batchsize=batchsize)

    # Task 0: params + synthetic gradients (stand-in for agent.loss().backward()).
    params_task0 = _make_params(k_p0)
    grads_task0 = _make_params(k_g0, scale=0.1)
    theta0 = flatten_to_slab(params_task0)
    gslab0 = flatten_to_slab(grads_task0)
    ewc.estimate_fisher(theta0, gslab0, task_idx=0)

    # Task 1: drifted parameters; compute the EWC penalty with the Pallas kernel.
    params_task1 = jax.tree_util.tree_map(
        lambda p, d: p + 0.05 * d, params_task0, _make_params(k_d1)
    )
    theta1 = flatten_to_slab(params_task1)
    loss1 = jax.block_until_ready(ewc.compute_ewc_loss(theta1, task_idx=1))

    # Pure-JAX references.
    def _fisher0_ref(n):
        g = grads_task0[n].astype(jnp.float32)
        return (g * g) / batchsize

    def ref_loss1():
        total = 0.0
        for n in params_task0:
            d = params_task1[n] - params_task0[n]
            total = total + jnp.sum(gamma * _fisher0_ref(n) * d * d)
        return 0.5 * total

    ref1 = jax.block_until_ready(ref_loss1())
    assert jnp.allclose(loss1, ref1, rtol=1e-4, atol=1e-6), (loss1, ref1)

    # Task 1 fisher (online path: decayed accumulation with the previous fisher).
    grads_task1 = _make_params(k_g1, scale=0.2)
    gslab1 = flatten_to_slab(grads_task1)
    ewc.estimate_fisher(theta1, gslab1, task_idx=1)

    # Task 2: new drifted parameters; EWC penalty against task-1 mean/fisher.
    params_task2 = jax.tree_util.tree_map(
        lambda p, d: p + 0.03 * d, params_task1, _make_params(k_d2)
    )
    theta2 = flatten_to_slab(params_task2)
    loss2 = jax.block_until_ready(ewc.compute_ewc_loss(theta2, task_idx=2))

    def _fisher1_ref(n):
        g1 = grads_task1[n].astype(jnp.float32)
        return (g1 * g1) / batchsize + gamma * _fisher0_ref(n)

    def ref_loss2():
        total = 0.0
        for n in params_task0:
            d = params_task2[n] - params_task1[n]
            total = total + jnp.sum(gamma * _fisher1_ref(n) * d * d)
        return 0.5 * total

    ref2 = jax.block_until_ready(ref_loss2())
    assert jnp.allclose(loss2, ref2, rtol=1e-4, atol=1e-6), (loss2, ref2)

    # ---------------- offline (multi-task) EWC: exercises the grid-over-T loss ----------------
    ewc_off = EWCPallas(ewc_gamma=gamma, online=False, batchsize=batchsize)
    ewc_off.estimate_fisher(theta0, gslab0, task_idx=0)   # stored as task 1
    ewc_off.estimate_fisher(theta1, gslab1, task_idx=1)   # stored as task 2
    loss_off = jax.block_until_ready(ewc_off.compute_ewc_loss(theta2, task_idx=2))

    def ref_loss_off():
        total = 0.0
        for n in params_task0:
            d = params_task2[n] - params_task0[n]
            total = total + jnp.sum(_fisher0_ref(n) * d * d)
            g1 = grads_task1[n].astype(jnp.float32)
            f1 = (g1 * g1) / batchsize
            d = params_task2[n] - params_task1[n]
            total = total + jnp.sum(f1 * d * d)
        return 0.5 * total

    ref_off = jax.block_until_ready(ref_loss_off())
    assert jnp.allclose(loss_off, ref_off, rtol=1e-4, atol=1e-6), (loss_off, ref_off)

    print("KERNEL_OK")
</pallas_src>

<mosaic_0001>
module attributes {stable_mosaic.version = 11 : i64} {
  func.func @_fisher_first_kernel(%arg0: i32, %arg1: memref<40x128xf32, #tpu.memory_space<vmem>>, %arg2: memref<1x40x128xf32, #tpu.memory_space<vmem>>) attributes {dimension_semantics = [#tpu.dimension_semantics<parallel>], iteration_bounds = array<i64: 1>, scalar_prefetch = 0 : i64, scratch_operands = 0 : i64, tpu.core_type = #tpu.core_type<tc>, window_params = [{transform_indices = @transform_0, window_bounds = array<i64: 40, 128>}, {transform_indices = @transform_1, window_bounds = array<i64: 1, 40, 128>}]} {
    %c0 = arith.constant 0 : index
    %c0_0 = arith.constant 0 : index
    %0 = vector.load %arg1[%c0, %c0_0] : memref<40x128xf32, #tpu.memory_space<vmem>>, vector<40x128xf32>
    %1 = arith.mulf %0, %0 : vector<40x128xf32>
    %cst = arith.constant 5.000000e-01 : f32
    %2 = vector.broadcast %cst : f32 to vector<40x128xf32>
    %3 = arith.mulf %1, %2 : vector<40x128xf32>
    %c0_1 = arith.constant 0 : index
    %c0_2 = arith.constant 0 : index
    %c0_3 = arith.constant 0 : index
    %4 = vector.load %arg2[%c0_1, %c0_2, %c0_3] : memref<1x40x128xf32, #tpu.memory_space<vmem>>, vector<1x40x128xf32>
    %5 = vector.shape_cast %4 : vector<1x40x128xf32> to vector<40x128xf32>
    %6 = vector.shape_cast %3 : vector<40x128xf32> to vector<1x40x128xf32>
    tpu.vector_store %arg2[%c0_1, %c0_2, %c0_3], %6 {strides = array<i32>} : memref<1x40x128xf32, #tpu.memory_space<vmem>>, vector<1x40x128xf32>,
    return
  }
  func.func @transform_0(%arg0: i32) -> (i32, i32) {
    %c0_i32 = arith.constant 0 : i32
    %c0_i32_0 = arith.constant 0 : i32
    return %arg0, %c0_i32 : i32, i32
  }
  func.func @transform_1(%arg0: i32) -> (i32, i32, i32) {
    %c0_i32 = arith.constant 0 : i32
    %c0_i32_0 = arith.constant 0 : i32
    %c0_i32_1 = arith.constant 0 : i32
    return %c0_i32, %arg0, %c0_i32_0 : i32, i32, i32
  }
}

</mosaic_0001>

<bundles_post_ra>
// kernel: tpu_custom_call.1
= control target key start
LH: loop header
LB: loop body
LE: loop exit
PB: predicated region body
PF: predicated region fallthrough
CT: control target
= control target key end

     0   :  { %6 = vsyncpa [#allocation3], 0  ;;  %s156_s0 = inlined_call_operand.hbm [shape: f32[40,128], index: 0, kind: input, shape index: {}]   ;;  %s157_s1 = inlined_call_operand.hbm [shape: f32[1,40,128], index: 1, kind: output, shape index: {}]  }
   0x1   :  { %7 = vsyncpa [#allocation4], 0  ;;  %s112_s6 = smov [#allocation2]   ;;  %s64_s10 = scalar_lea.hbm %s156_s0, 640 }
   0x2   :  { %s13_s7 = sshll.u32 %s112_s6, 4  ;;  %p65_p0 = scmp.ne.s32.totalorder %s156_s0, %s64_s10  ;;  %s14_s7 = int_to_ptr.vmem [resolvable:$true] %s13_s7 }
   0x3   :  { %p68_p1 = scmp.lt.u32.totalorder %s64_s10, %s156_s0 }
   0x5   :  { %p70_p2 = pnand %p68_p1, %p65_p0 }
   0x7   :  { %73 = shalt.err (!%p70_p2)
}
   0x8   :  { %s74_s15 = scalar_lea.vmem %s14_s7, 640  ;;  %p79_p4 = scmp.lt.s32.totalorder %s14_s7, %s14_s7 }
   0x9   :  { %p75_p3 = scmp.ne.s32.totalorder %s14_s7, %s74_s15  ;;  %p80_p5 = scmp.lt.s32.totalorder %s74_s15, %s74_s15 }
   0xb   :  { %p81_p6 = por %p80_p5, %p79_p4 }
   0xd   :  { %p82_p7 = pnand %p81_p6, %p75_p3 }
   0xf   :  { %85 = shalt.err (!%p82_p7)
}
  0x10   :  { %s113_s16 = smov 128   ;;  %s114_s17 = smov 8  }
  0x11   :  { %19 = dma.hbm_to_vmem [thread:$0]  %s156_s0, 640, %s14_s7, [#allocation3], %s113_s16, %s113_s16, %s114_s17  }
  0x12   :  { %108 = dma.done.wait [#allocation3], 640  }
  0x13   :  { %109 = vsyncadd [#allocation3], 4294966656  ;;  %v23_v0 = vld [vmem:[#allocation2] sm:$0xff]  ;;  %v24_v1 = vld [vmem:[#allocation2 + $0x8] sm:$0xff]  ;;  %s115_s20 = smov [#allocation5]  }
  0x14   :  { %v25_v2 = vld [vmem:[#allocation2 + $0x10] sm:$0xff]  ;;  %v28_v3 = vmul.f32 %v23_v0, %v23_v0  ;;  %v29_v4 = vmul.f32 %v24_v1, %v24_v1  ;;  %v26_v6 = vld [vmem:[#allocation2 + $0x18] sm:$0xff]  ;;  %v27_v7 = vld [vmem:[#allocation2 + $0x20] sm:$0xff]  ;;  %s48_s21 = sshll.u32 %s115_s20, 4  ;;  %s49_s21 = int_to_ptr.vmem [resolvable:$true] %s48_s21 }
  0x15   :  { %v30_v5 = vmul.f32 %v25_v2, %v25_v2  ;;  %v31_v8 = vmul.f32 %v26_v6, %v26_v6  ;;  %v32_v9 = vmul.f32 %v27_v7, %v27_v7  ;;  %s86_s0 = scalar_lea.vmem %s49_s21, 640  ;;  %p91_p9 = scmp.lt.s32.totalorder %s49_s21, %s49_s21 }
  0x16   :  { %v33_v10 = vmul.f32 0.5, %v28_v3  ;;  %v34_v11 = vmul.f32 0.5, %v29_v4  ;;  %p87_p8 = scmp.ne.s32.totalorder %s49_s21, %s86_s0  ;;  %p92_p10 = scmp.lt.s32.totalorder %s86_s0, %s86_s0 }
  0x17   :  { %v35_v12 = vmul.f32 0.5, %v30_v5  ;;  %v36_v13 = vmul.f32 0.5, %v31_v8  ;;  %v37_v14 = vmul.f32 0.5, %v32_v9 }
  0x18   :  { %38 = vst [vmem:[#allocation5] sm:$0xff] %v33_v10  ;;  %39 = vst [vmem:[#allocation5 + $0x8] sm:$0xff] %v34_v11  ;;  %p93_p11 = por %p92_p10, %p91_p9 }
  0x19   :  { %40 = vst [vmem:[#allocation5 + $0x10] sm:$0xff] %v35_v12  ;;  %41 = vst [vmem:[#allocation5 + $0x18] sm:$0xff] %v36_v13 }
  0x1a   :  { %42 = vst [vmem:[#allocation5 + $0x20] sm:$0xff] %v37_v14  ;;  %p94_p12 = pnand %p93_p11, %p87_p8 }
  0x1c   :  { %97 = shalt.err (!%p94_p12)
}
  0x1d   :  { %s98_s24 = scalar_lea.hbm %s157_s1, 640 }
  0x1e   :  { %p99_p13 = scmp.ne.s32.totalorder %s157_s1, %s98_s24  ;;  %p102_p0 = scmp.lt.u32.totalorder %s98_s24, %s157_s1 }
  0x20   :  { %p104_p1 = pnand %p102_p0, %p99_p13 }
  0x22   :  { %107 = shalt.err (!%p104_p1)
}
  0x23   :  { %54 = dma.vmem_to_hbm [thread:$0]  %s49_s21, 640, %s157_s1, [#allocation4], %s113_s16, %s113_s16, %s114_s17  }
  0x24   :  { %110 = dma.done.wait [#allocation4], 640  }
  0x25   :  { %111 = vsyncadd [#allocation4], 4294966656 }
  0x26   :  { %58 = vsyncpa [#allocation3], 1 }
  0x27   :  { %59 = vsyncpa [#allocation4], 1 }

</bundles_post_ra>
